<compile_context>
chip_gen: v7x
topology: tpu7x:2x2x1
jax: 0.10.0
libtpu: 0.0.40
codegen_flags: <defaults>
</compile_context>

<pallas_src>
import jax
import jax.numpy as jnp
from jax.experimental import pallas as pl
from jax.experimental.pallas import tpu as pltpu


def _round_up(x, m):
    return (x + m - 1) // m * m


# --------------------------------------------------------------------------- #
# Kernel: one tile of rows, fused gated-attention forward (MXU + VPU/EUP).
# --------------------------------------------------------------------------- #
def gated_attn_kernel(x_ref, wab_ref, bab_ref, wc_ref, bc_ref, attn_ref):
    x = x_ref[...]                               # native dtype (bf16/f32) -> MXU
    d = wab_ref.shape[1] // 2                    # lane-aligned split (D padded to 128)

    # Fused attention_a / attention_b projection: one (tile, L) x (L, 2D) matmul.
    ab = jnp.dot(x, wab_ref[...], preferred_element_type=jnp.float32)
    ab = ab + bab_ref[...]                       # bias pre-cast to f32 in wrapper

    a = jnp.tanh(ab[:, :d])                      # attention_a: Tanh     (EUP, f32)
    b = jax.nn.sigmoid(ab[:, d:])                # attention_b: Sigmoid  (EUP, f32)
    gated = (a * b).astype(wc_ref.dtype)         # back to MXU dtype for last dot

    # attention_c: (tile, D_pad) x (D_pad, C); padded D rows of Wc are zero.
    attn = jnp.dot(gated, wc_ref[...], preferred_element_type=jnp.float32)
    attn_ref[...] = (attn + bc_ref[...]).astype(attn_ref.dtype)


# --------------------------------------------------------------------------- #
# One-off parameter preparation (call at load time, NOT per forward).
# --------------------------------------------------------------------------- #
def prepare_params(wa, ba, wb, bb, wc, bc):
    """Fuse / pad parameters once.

    wa, wb: (L, D) pre-transposed torch weights; ba, bb: (D,) or (1, D).
    wc: (D, C); bc: (C,) or (1, C).
    Returns (wab, bab, wc_p, bc_f32):
      wab  (L, 2*D_pad)   fused [Wa | Wb], each gate zero-padded to 128 lanes
      bab  (1, 2*D_pad)   fused f32 biases
      wc_p (D_pad, C)     Wc with zero-padded rows matching the gate padding
      bc_f (1, C)         f32 bias
    """
    L, D = wa.shape
    C = wc.shape[1]
    d_pad = _round_up(D, 128)

    pad_w = lambda w: jnp.pad(w, ((0, 0), (0, d_pad - D)))
    pad_b = lambda b: jnp.pad(b.reshape(1, D).astype(jnp.float32),
                              ((0, 0), (0, d_pad - D)))
    wab = jnp.concatenate([pad_w(wa), pad_w(wb)], axis=1)          # (L, 2*d_pad)
    bab = jnp.concatenate([pad_b(ba), pad_b(bb)], axis=1)          # (1, 2*d_pad) f32
    wc_p = jnp.pad(wc, ((0, d_pad - D), (0, 0)))                   # (d_pad, C)
    bc_f = bc.reshape(1, C).astype(jnp.float32)                    # (1, C) f32
    return wab, bab, wc_p, bc_f


def _choose_row_tile(N, L, two_d, C, itemsize, max_rows, budget_bytes):
    """Largest sublane-aligned row tile that fits the streaming VMEM budget."""
    sub = {4: 8, 2: 16, 1: 32}.get(itemsize, 8)
    # double-buffered x + out tiles plus generous f32 intermediates, per row
    per_row = 2 * (L + C) * itemsize + 4 * two_d * 4
    tile = max(sub, _round_up(min(max_rows, N), sub))
    while tile > sub and tile * per_row > budget_bytes:
        tile = max(sub, _round_up(tile // 2, sub))
    if tile >= N:
        return N                      # one block == full array (always legal)
    steps = pl.cdiv(N, tile)
    if steps % 2 == 1:                # v7x megacore: keep the two TCs balanced
        tile = max(sub, _round_up(pl.cdiv(N, steps + 1), sub))
        if tile >= N:
            return N
    return tile


# --------------------------------------------------------------------------- #
# Forward wrapper.  Returns (A, x), matching the PyTorch forward.
# --------------------------------------------------------------------------- #
def attn_net_gated(x, params, *, row_tile=2048):
    wab, bab, wc, bc = params
    N, L = x.shape
    two_d = wab.shape[1]
    d_pad, C = wc.shape
    itemsize = jnp.dtype(x.dtype).itemsize

    # VMEM ceiling: ~75% of per-core VMEM (v7x 64 MiB -> ~48 MiB, v5e/v6e
    # 128 MiB -> ~96 MiB).  Fall back to a conservative 64 MiB if unqueryable.
    try:
        vmem_cap = int(getattr(pltpu.get_tpu_info(), "vmem_capacity_bytes",
                               64 * 2**20))
    except Exception:
        vmem_cap = 64 * 2**20
    vmem_ceiling = int(0.75 * vmem_cap)

    weight_bytes = sum(int(a.size) * jnp.dtype(a.dtype).itemsize
                       for a in (wab, bab, wc, bc))
    stream_budget = max(1, vmem_ceiling - 2 * weight_bytes)

    tile = _choose_row_tile(N, L, two_d, C, itemsize, row_tile, stream_budget)
    grid = (pl.cdiv(N, tile),)

    vmem_est = (2 * tile * (L + C) * itemsize   # x / out tiles (double-buffered)
                + 2 * weight_bytes              # resident params (double-buffered)
                + 4 * tile * two_d * 4)         # f32 intermediates
    vmem_limit = max(32 * 2**20, min(vmem_ceiling, 2 * vmem_est))

    resident = lambda shape: pl.BlockSpec(shape, lambda i: (0, 0))

    attn = pl.pallas_call(
        gated_attn_kernel,
        out_shape=jax.ShapeDtypeStruct((N, C), x.dtype),
        grid_spec=pltpu.PrefetchScalarGridSpec(
            num_scalar_prefetch=0,
            grid=grid,
            in_specs=[
                pl.BlockSpec((tile, L), lambda i: (i, 0)),   # streamed x rows
                resident((L, two_d)),                        # fused [Wa | Wb]
                resident((1, two_d)),                        # fused f32 biases
                resident((d_pad, C)),                        # Wc (row-padded)
                resident((1, C)),                            # bc (f32)
            ],
            out_specs=pl.BlockSpec((tile, C), lambda i: (i, 0)),
        ),
        compiler_params=pltpu.CompilerParams(
            dimension_semantics=("parallel",),
            vmem_limit_bytes=vmem_limit,
        ),
    )(x, wab, bab, wc, bc)

    return attn, x


def init_params(key, L, D, n_classes, dtype=jnp.float32):
    """Deterministic synthetic parameters (torch Linear init, pre-transposed)."""
    ks = jax.random.split(key, 6)
    sa = 1.0 / jnp.sqrt(L)
    sc = 1.0 / jnp.sqrt(D)
    wa = jax.random.uniform(ks[0], (L, D), dtype, -sa, sa)
    ba = jax.random.uniform(ks[1], (1, D), dtype, -sa, sa)
    wb = jax.random.uniform(ks[2], (L, D), dtype, -sa, sa)
    bb = jax.random.uniform(ks[3], (1, D), dtype, -sa, sa)
    wc = jax.random.uniform(ks[4], (D, n_classes), dtype, -sc, sc)
    bc = jax.random.uniform(ks[5], (1, n_classes), dtype, -sc, sc)
    return wa, ba, wb, bb, wc, bc


if __name__ == "__main__":
    # Small shapes consistent with the module (N tokens of dim L -> hidden D -> C).
    N, L, D, n_classes = 200, 128, 128, 1
    # TODO(synk): training-mode Dropout(0.25) omitted (inference-only forward path).

    key = jax.random.PRNGKey(0)
    kx, kp = jax.random.split(key)
    x = jax.random.normal(kx, (N, L), dtype=jnp.float32)
    wa, ba, wb, bb, wc, bc = init_params(kp, L, D, n_classes)

    # Pure-JAX reference.
    a_ref = jnp.tanh(x @ wa + ba)
    b_ref = jax.nn.sigmoid(x @ wb + bb)
    A_ref = (a_ref * b_ref) @ wc + bc

    # f32 path: small explicit row_tile exercises the cdiv grid with a clipped
    # boundary block (N=200, tile=64 -> 4 steps, last block partially valid).
    params = prepare_params(wa, ba, wb, bb, wc, bc)      # one-off, load-time fusion
    A, x_out = attn_net_gated(x, params, row_tile=64)
    jax.block_until_ready((A, x_out))
    assert A.shape == (N, n_classes), f"bad output shape {A.shape}"
    assert jnp.allclose(A, A_ref, atol=2e-3, rtol=2e-3), "f32 mismatch vs reference"
    assert jnp.array_equal(x_out, x), "x passthrough mismatch"

    # bf16 path: default (large) row tile -> a single full-array block; native
    # bf16 operands go straight into the MXU, accumulation stays f32.
    cast = lambda t: t.astype(jnp.bfloat16)
    params16 = prepare_params(cast(wa), cast(ba), cast(wb), cast(bb),
                              cast(wc), cast(bc))
    A16, _ = attn_net_gated(cast(x), params16)
    jax.block_until_ready(A16)
    assert A16.shape == (N, n_classes)
    assert jnp.allclose(A16.astype(jnp.float32), A_ref, atol=5e-2, rtol=5e-2), \
        "bf16 mismatch vs reference"

    print("KERNEL_OK")
</pallas_src>

<mosaic_0001>
module attributes {stable_mosaic.version = 11 : i64} {
  func.func @gated_attn_kernel(%arg0: i32, %arg1: memref<64x128xf32, #tpu.memory_space<vmem>>, %arg2: memref<128x256xf32, #tpu.memory_space<vmem>>, %arg3: memref<1x256xf32, #tpu.memory_space<vmem>>, %arg4: memref<128x1xf32, #tpu.memory_space<vmem>>, %arg5: memref<1x1xf32, #tpu.memory_space<vmem>>, %arg6: memref<64x1xf32, #tpu.memory_space<vmem>>) attributes {dimension_semantics = [#tpu.dimension_semantics<parallel>], iteration_bounds = array<i64: 4>, scalar_prefetch = 0 : i64, scratch_operands = 0 : i64, tpu.core_type = #tpu.core_type<tc>, window_params = [{transform_indices = @transform_0, window_bounds = array<i64: 64, 128>}, {pipeline_mode = #tpu.pipeline_mode<synchronous>, transform_indices = @transform_1, window_bounds = array<i64: 128, 256>}, {pipeline_mode = #tpu.pipeline_mode<synchronous>, transform_indices = @transform_2, window_bounds = array<i64: 1, 256>}, {pipeline_mode = #tpu.pipeline_mode<synchronous>, transform_indices = @transform_3, window_bounds = array<i64: 128, 1>}, {pipeline_mode = #tpu.pipeline_mode<synchronous>, transform_indices = @transform_4, window_bounds = array<i64: 1, 1>}, {transform_indices = @transform_5, window_bounds = array<i64: 64, 1>}]} {
    %c0 = arith.constant 0 : index
    %c0_0 = arith.constant 0 : index
    %0 = vector.load %arg1[%c0, %c0_0] : memref<64x128xf32, #tpu.memory_space<vmem>>, vector<64x128xf32>
    %c0_1 = arith.constant 0 : index
    %c0_2 = arith.constant 0 : index
    %1 = vector.load %arg2[%c0_1, %c0_2] : memref<128x256xf32, #tpu.memory_space<vmem>>, vector<128x256xf32>
    %cst = arith.constant dense<0.000000e+00> : vector<64x256xf32>
    %2 = tpu.matmul %0, %1, %cst {dimension_numbers = #tpu.dot_dimension_numbers<[1], [0], [0], [1], [0, 0, 1, 1], [], []>} : vector<64x128xf32>, vector<128x256xf32>, vector<64x256xf32> -> vector<64x256xf32>
    %c0_3 = arith.constant 0 : index
    %c0_4 = arith.constant 0 : index
    %3 = vector.load %arg3[%c0_3, %c0_4] : memref<1x256xf32, #tpu.memory_space<vmem>>, vector<1x256xf32>
    %4 = vector.broadcast %3 : vector<1x256xf32> to vector<64x256xf32>
    %5 = arith.addf %2, %4 : vector<64x256xf32>
    %6 = vector.extract_strided_slice %5 {offsets = [0, 0], sizes = [64, 128], strides = [1, 1]} : vector<64x256xf32> to vector<64x128xf32>
    %7 = math.tanh %6 : vector<64x128xf32>
    %8 = vector.extract_strided_slice %5 {offsets = [0, 128], sizes = [64, 128], strides = [1, 1]} : vector<64x256xf32> to vector<64x128xf32>
    %9 = arith.negf %8 : vector<64x128xf32>
    %10 = math.exp %9 : vector<64x128xf32>
    %cst_5 = arith.constant 1.000000e+00 : f32
    %11 = vector.broadcast %cst_5 : f32 to vector<64x128xf32>
    %12 = arith.addf %11, %10 : vector<64x128xf32>
    %13 = arith.divf %11, %12 : vector<64x128xf32>
    %14 = arith.mulf %7, %13 : vector<64x128xf32>
    %c0_6 = arith.constant 0 : index
    %c0_7 = arith.constant 0 : index
    %15 = vector.load %arg4[%c0_6, %c0_7] : memref<128x1xf32, #tpu.memory_space<vmem>>, vector<128x1xf32>
    %cst_8 = arith.constant dense<0.000000e+00> : vector<64x1xf32>
    %16 = tpu.matmul %14, %15, %cst_8 {dimension_numbers = #tpu.dot_dimension_numbers<[1], [0], [0], [1], [0, 0, 1, 1], [], []>} : vector<64x128xf32>, vector<128x1xf32>, vector<64x1xf32> -> vector<64x1xf32>
    %c0_9 = arith.constant 0 : index
    %c0_10 = arith.constant 0 : index
    %17 = vector.load %arg5[%c0_9, %c0_10] : memref<1x1xf32, #tpu.memory_space<vmem>>, vector<1x1xf32>
    %18 = vector.broadcast %17 : vector<1x1xf32> to vector<64x1xf32>
    %19 = arith.addf %16, %18 : vector<64x1xf32>
    %c0_11 = arith.constant 0 : index
    %c0_12 = arith.constant 0 : index
    %20 = vector.load %arg6[%c0_11, %c0_12] : memref<64x1xf32, #tpu.memory_space<vmem>>, vector<64x1xf32>
    tpu.vector_store %arg6[%c0_11, %c0_12], %19 {strides = array<i32>} : memref<64x1xf32, #tpu.memory_space<vmem>>, vector<64x1xf32>,
    return
  }
  func.func @transform_0(%arg0: i32) -> (i32, i32) {
    %c0_i32 = arith.constant 0 : i32
    %c0_i32_0 = arith.constant 0 : i32
    return %arg0, %c0_i32 : i32, i32
  }
  func.func @transform_1(%arg0: i32) -> (i32, i32) {
    %c0_i32 = arith.constant 0 : i32
    %c0_i32_0 = arith.constant 0 : i32
    %c0_i32_1 = arith.constant 0 : i32
    return %c0_i32, %c0_i32_0 : i32, i32
  }
  func.func @transform_2(%arg0: i32) -> (i32, i32) {
    %c0_i32 = arith.constant 0 : i32
    %c0_i32_0 = arith.constant 0 : i32
    %c0_i32_1 = arith.constant 0 : i32
    return %c0_i32, %c0_i32_0 : i32, i32
  }
  func.func @transform_3(%arg0: i32) -> (i32, i32) {
    %c0_i32 = arith.constant 0 : i32
    %c0_i32_0 = arith.constant 0 : i32
    %c0_i32_1 = arith.constant 0 : i32
    return %c0_i32, %c0_i32_0 : i32, i32
  }
  func.func @transform_4(%arg0: i32) -> (i32, i32) {
    %c0_i32 = arith.constant 0 : i32
    %c0_i32_0 = arith.constant 0 : i32
    %c0_i32_1 = arith.constant 0 : i32
    return %c0_i32, %c0_i32_0 : i32, i32
  }
  func.func @transform_5(%arg0: i32) -> (i32, i32) {
    %c0_i32 = arith.constant 0 : i32
    %c0_i32_0 = arith.constant 0 : i32
    return %arg0, %c0_i32 : i32, i32
  }
}

</mosaic_0001>

<bundles_post_ra>
// kernel: tpu_custom_call.1
= control target key start
LH: loop header
LB: loop body
LE: loop exit
PB: predicated region body
PF: predicated region fallthrough
CT: control target
= control target key end

     0   :  { %s1741_s0 = inlined_call_operand.hbm [shape: f32[200,128], index: 0, kind: input, shape index: {}]   ;;  %s1742_s1 = inlined_call_operand.hbm [shape: f32[128,256], index: 1, kind: input, shape index: {}]   ;;  %s1743_s2 = inlined_call_operand.vmem [shape: f32[1,256], index: 2, kind: input, shape index: {}]   ;;  %s1744_s3 = inlined_call_operand.vmem [shape: f32[128,1], index: 3, kind: input, shape index: {}]   ;;  %s1745_s4 = inlined_call_operand.<no memory space> [shape: f32[1,1], index: 4, kind: input, shape index: {}]   ;;  %s1746_s5 = inlined_call_operand.vmem [shape: f32[200,1], index: 5, kind: output, shape index: {}]  }
   0x1   :  { %v10_v0 = vstv %s1745_s4 }
   0x2   :  { %11 = vst [vmem:[#allocation2] sm:$0x1] %v10_v0 }
   0x3   :  { %12 = vsyncpa [#allocation4], 0 }
   0x4   :  { %14 = vsyncpa [#allocation4 + $0x1], 0 }
   0x5   :  { %15 = vsyncpa [#allocation6], 0  ;;  %s1440_s20 = smov 0   ;;  %s1442_s21 = smov 0  }
   0x6   :  { %s1444_s22 = smov 0   ;;  %s1446_s23 = smov 0  }
   0x7 LB: > { %s1459_s4 = sadd.s32 4294967295, %s1366_s23   ;;  %s1462_s24 = sadd.s32 1, %s1366_s23   ;;  %s1366_s23 = sphi %s1446_s23, %s1767_s23   ;;  %s1362_s22 = sphi %s1444_s22, %s1766_s22   ;;  %s1358_s21 = sphi %s1442_s21, %s1765_s21   ;;  %s1354_s20 = sphi %s1440_s20, %s1764_s20  }
   0x8   : > { %s25_s25 = ssub.s32 %s1366_s23, %s1462_s24  ;;  %s28_s26 = sadd.s32 1, %s1362_s22 }
   0x9   : > { %p26_p0 = scmp.eq.s32.totalorder %s25_s25, 0  ;;  %p35_p1 = scmp.ne.s32.totalorder %s1362_s22, %s1358_s21 }
   0xa   : > { %p36_p2 = scmp.eq.s32.totalorder %s1366_s23, 0  ;;  %p41_p3 = scmp.ne.s32.totalorder %s1358_s21, %s1354_s20 }
   0xb   : > { %s1472_s27 = scalar_select %p26_p0, %s1362_s22, %s28_s26  }
   0xc   : > { %p1474_p4 = por %p36_p2, %p35_p1  ;;  %p1747_p5 = scmp.eq.s32.totalorder %s1459_s4, 0 }
   0xd   : > { %p149_p6 = scmp.eq.s32.totalorder %s1459_s4, 3  ;;  %p903_p7 = scmp.ge.s32.totalorder %s1366_s23, 1 }
   0xe   : > { %s1750_s28 = scalar_select %p1474_p4, 1, 0 }
   0xf   : > { %p1483_p8 = por %p1747_p5, %p41_p3  ;;  %p162_p9 = scmp.lt.s32.totalorder %s1366_s23, 5 }
  0x10   : > { %p1488_p10 = por %p149_p6, %p35_p1  ;;  %s1400_s7 = smov [#allocation5]  }
  0x11   : > { %s1751_s29 = scalar_select %p1483_p8, 1, 0 }
  0x12   : > { %s1752_s30 = scalar_select %p1488_p10, 1, 0 }
  0x13   : > { %p1492_p11 = pnand %p903_p7, %p162_p9  ;;  %s174_s8 = sshll.u32 %s1400_s7, 4  ;;  %s175_s8 = int_to_ptr.vmem [resolvable:$true] %s174_s8 }
  0x14   : > { %s1240_s12 = scalar_lea.hbm %s1742_s1, 4096 }
  0x15   : > { %s1753_s6 = scalar_select %p1492_p11, 1, 0 }
  0x16   : > { %p1084_p12 = pneg %p1492_p11  ;;  %p1241_p0 = scmp.ne.s32.totalorder %s1742_s1, %s1240_s12 }
  0x17   : > { %p1247_p6 = scmp.lt.u32.totalorder %s1240_s12, %s1742_s1 }
  0x18   : > { %p1500_p13 = pnand %p1084_p12, %p1747_p5 }
  0x1a   : > { %p1242_p1 = pneg %p1500_p13 }
  0x1c   : > { %p1243_p2 = pnand %p1242_p1, %p1241_p0 }
  0x1e   : > { %p1244_p3 = pneg %p1243_p2 }
  0x20   : > { %p1249_p7 = pnand %p1247_p6, %p1244_p3 }
  0x22   : > { %1252 = shalt.err (!%p1249_p7)
}
  0x23   : > { %s1253_s17 = scalar_lea.vmem %s175_s8, 4096  ;;  %p1261_p10 = scmp.lt.s32.totalorder %s175_s8, %s175_s8 }
  0x24   : > { %p1254_p9 = scmp.ne.s32.totalorder %s175_s8, %s1253_s17  ;;  %p1262_p8 = scmp.lt.s32.totalorder %s1253_s17, %s1253_s17 }
  0x26   : > { %p1256_p12 = pnand %p1254_p9, %p1242_p1  ;;  %p1263_p11 = por %p1262_p8, %p1261_p10 }
  0x28   : > { %p1257_p5 = pneg %p1256_p12 }
  0x2a   : > { %p1264_p4 = pnand %p1263_p11, %p1257_p5 }
  0x2c   : > { %1267 = shalt.err (!%p1264_p4)
}
  0x2d   : > { %s1401_s18 = smov 256   ;;  %s1402_s19 = smov 16  }
  0x2e   : > { %1087 = dma.hbm_to_vmem [thread:$0]  (!%p1500_p13), %s1742_s1, 4096, %s175_s8, [#allocation6], %s1401_s18, %s1401_s18, %s1402_s19  }
  0x2f   : > { %p905_p0 = scmp.ge.s32.totalorder %s1366_s23, 4 }
  0x30   : > { %p1755_p2 = scmp.ne.s32.totalorder (!%p905_p0), %s1750_s28, 0 }
  0x31   : > { %193 = sbr.rel (%p905_p0) target bundleno = 91 (0x5b), region = 32 }
  0x38   : > { %196 = sbr.rel (!%p1755_p2) target bundleno = 91 (0x5b), region = 36  ;;  %s197_s26 = sand.u32 (%p1755_p2), 1, %s1362_s22  }
  0x39   : > { %s907_s7 = sshll.u32 (%p1755_p2), %s1366_s23, 3  ;;  %s906_s10 = sshll.u32 (%p1755_p2), %s197_s26, 6 }
  0x3a   : > { %s203_s11 = ssub.s32 (%p1755_p2), 25, %s907_s7  ;;  %s1528_s13 = scalar_lea.sflag (%p1755_p2), [#allocation4], %s197_s26 }
  0x3b   : > { %p204_p4 = scmp.lt.s32.totalorder (%p1755_p2), %s203_s11, 8  ;;  %s201_s8 = scalar_lea.vmem (%p1755_p2), [#allocation3], %s906_s10 }
  0x3f   : > { %s1769_s11 = smov (!%p204_p4, %s203_s11), 8 }
  0x40   : > { %s1525_s12 = sshll.u32 %s1769_s11, 7 }
  0x41   : > { %s208_s9 = ssub.s32 1024, %s1525_s12 }
  0x42   : > { %209 = vsyncadd %s1528_s13, %s208_s9  ;;  %p909_p5 = scmp.ne.s32.totalorder %s1525_s12, 0  ;;  %s943_s28 = sshll.u32 %s1366_s23, 10 }
  0x43   : > { %s1536_s16 = scalar_lea.hbm %s1741_s0, %s943_s28  ;;  %s214_s17 = sshll.u32 %s201_s8, 4  ;;  %s1538_s17 = int_to_ptr.vmem [resolvable:$true] %s214_s17 }
  0x44   : > { %s1268_s18 = scalar_lea.hbm %s1536_s16, %s1525_s12  ;;  %s1272_s23 = scalar_lea.hbm %s1741_s0, 3200 }
  0x45   : > { %p1269_p8 = scmp.ne.s32.totalorder %s1536_s16, %s1268_s18  ;;  %p1273_p13 = scmp.lt.u32.totalorder %s1536_s16, %s1741_s0 }
  0x46   : > { %p1274_p1 = scmp.lt.u32.totalorder %s1272_s23, %s1268_s18  ;;  %p1276_p6 = scmp.lt.u32.totalorder %s1268_s18, %s1536_s16 }
  0x47   : > { %p1270_p10 = pnand %p1269_p8, %p909_p5 }
  0x48   : > { %p1275_p3 = por %p1274_p1, %p1273_p13 }
  0x49   : > { %p1271_p11 = pneg %p1270_p10 }
  0x4a   : > { %p1277_p7 = por %p1276_p6, %p1275_p3 }
  0x4c   : > { %p1278_p9 = pnand %p1277_p7, %p1271_p11 }
  0x4e   : > { %1281 = shalt.err (!%p1278_p9)
}
  0x4f   : > { %s1282_s7 = scalar_lea.vmem %s1538_s17, %s1525_s12  ;;  %s1403_s10 = smov [#allocation3]  }
  0x50   : > { %p1283_p12 = scmp.ne.s32.totalorder %s1538_s17, %s1282_s7  ;;  %s1286_s11 = sshll.u32 %s1403_s10, 4  ;;  %s1287_s11 = int_to_ptr.vmem [resolvable:$false] %s1286_s11 }
  0x51   : > { %s1288_s9 = scalar_lea.vmem %s1287_s11, 2048  ;;  %p1289_p4 = scmp.lt.s32.totalorder %s1538_s17, %s1287_s11 }
  0x52   : > { %p1284_p0 = pnand %p1283_p12, %p909_p5  ;;  %p1290_p8 = scmp.lt.s32.totalorder %s1288_s9, %s1282_s7 }
  0x54   : > { %p1285_p2 = pneg %p1284_p0  ;;  %p1291_p10 = por %p1290_p8, %p1289_p4 }
  0x56   : > { %p1292_p13 = pnand %p1291_p10, %p1285_p2 }
  0x58   : > { %1295 = shalt.err (!%p1292_p13)
}
  0x59   : > { %s1404_s8 = smov 128   ;;  %s1405_s28 = smov 8  }
  0x5a   : > { %220 = dma.hbm_to_vmem [thread:$0]  (%p909_p5), %s1536_s16, %s1525_s12, %s1538_s17, %s1528_s13, %s1404_s8, %s1404_s8, %s1405_s28  }
  0x5b PF: > { %p1756_p11 = scmp.ne.s32.totalorder %s1753_s6, 0 }
  0x5c   : > { %s228_s14 = sand.u32 (!%p1756_p11), 1, %s1358_s21   ;;  %p1757_p1 = scmp.ne.s32.totalorder (!%p1756_p11), %s1751_s29, 0 }
  0x5d   : > { %226 = sbr.rel (%p1756_p11) target bundleno = 675 (0x2a3), region = 40  ;;  %s1568_s15 = sshll.u32 (!%p1756_p11), %s228_s14, 6 }
  0x5e   : > { %s229_s18 = scalar_lea.sflag (!%p1756_p11), [#allocation4], %s228_s14  ;;  %s1571_s19 = scalar_lea.vmem (!%p1756_p11), [#allocation3], %s1568_s15 }
  0x64   : > { %1345 = dma.done.wait (%p1757_p1), %s229_s18, 1024  }
  0x65   : > { %1347 = vsyncadd (%p1757_p1), %s229_s18, 4294966272  ;;  %p1758_p5 = scmp.eq.s32.totalorder %s1459_s4, 0 }
  0x67   : > { %1349 = dma.done.wait (%p1758_p5), [#allocation6], 4096   ;;  %p1759_p3 = pmov %p1758_p5 }
  0x68   : > { %v1406_v1 = vmov 0.0   ;;  %v281_v2 = vld [vmem:[#allocation5 + $0x8] sm:$0xff]  ;;  %v283_v3 = vld [vmem:[#allocation5 + $0x18] sm:$0xff]  ;;  %v280_v4 = vld [vmem:[#allocation5] sm:$0xff]  ;;  %vm629_vm0 = vcmask 7168   ;;  %s1659_s28 = scalar_lea.vmem [#allocation7], %s1568_s15  }
  0x69   : > { %1351 = vsyncadd (%p1759_p3), [#allocation6], 4294963200  ;;  %388 = vmatprep.mubr.f32.mxu0 %v1406_v1  ;;  %v1015_v5 = vpack.c.bf16 %v283_v3, %v281_v2  ;;  %v282_v6 = vld [vmem:[#allocation5 + $0x10] sm:$0xff]  ;;  %v285_v7 = vld [vmem:[#allocation5 + $0x28] sm:$0xff]  ;;  %p1760_p6 = scmp.ne.s32.totalorder %s1752_s30, 0 }
  0x6a   : > { %v287_v8 = vld [vmem:[#allocation5 + $0x38] sm:$0xff]  ;;  %v1017_v9 = vpack.c.bf16 %v282_v6, %v280_v4  ;;  %v284_v11 = vld [vmem:[#allocation5 + $0x20] sm:$0xff]  ;;  %v286_v12 = vld [vmem:[#allocation5 + $0x30] sm:$0xff]  ;;  %s927_s15 = sshll.u32 (%p1760_p6), %s1459_s4, 3  ;;  %s944_s14 = sshll.u32 (%p1760_p6), %s1459_s4, 6 }
  0x6b   : > { %v1019_v10 = vpack.c.bf16 %v287_v8, %v285_v7  ;;  %v289_v13 = vld [vmem:[#allocation5 + $0x48] sm:$0xff]  ;;  %1016 = vmatprep.subr.bf16.mxu0 %v1015_v5  ;;  %v291_v14 = vld [vmem:[#allocation5 + $0x58] sm:$0xff]  ;;  %v1021_v15 = vpack.c.bf16 %v286_v12, %v284_v11  ;;  %v288_v17 = vld [vmem:[#allocation5 + $0x40] sm:$0xff]  ;;  %s646_s18 = ssub.s32 (%p1760_p6), 25, %s927_s15  ;;  %s1684_s6 = scalar_lea.vmem (%p1760_p6), %s1746_s5, %s944_s14  }
  0x6c   : > { %1018 = vmatpush1.bf16.msra.mxu0 %v1017_v9  ;;  %v1023_v16 = vpack.c.bf16 %v291_v14, %v289_v13  ;;  %v290_v18 = vld [vmem:[#allocation5 + $0x50] sm:$0xff]  ;;  %v293_v19 = vld [vmem:[#allocation5 + $0x68] sm:$0xff]  ;;  %v295_v20 = vld [vmem:[#allocation5 + $0x78] sm:$0xff]  ;;  %p647_p7 = scmp.lt.s32.totalorder (%p1760_p6), %s646_s18, 8 }
  0x6d   : > { %1020 = vmatprep.subr.bf16.mxu0 %v1019_v10  ;;  %v1025_v21 = vpack.c.bf16 %v290_v18, %v288_v17  ;;  %v1027_v22 = vpack.c.bf16 %v295_v20, %v293_v19  ;;  %v292_v23 = vld [vmem:[#allocation5 + $0x60] sm:$0xff]  ;;  %v294_v24 = vld [vmem:[#allocation5 + $0x70] sm:$0xff]  ;;  %v297_v25 = vld [vmem:[#allocation5 + $0x88] sm:$0xff]  ;;  %v314_v18 = vlaneseq }
  0x6e   : > { %v299_v26 = vld [vmem:[#allocation5 + $0x98] sm:$0xff]  ;;  %v1029_v27 = vpack.c.bf16 %v294_v24, %v292_v23  ;;  %v296_v29 = vld [vmem:[#allocation5 + $0x80] sm:$0xff]  ;;  %v298_v30 = vld [vmem:[#allocation5 + $0x90] sm:$0xff] }
  0x6f   : > { %v1031_v28 = vpack.c.bf16 %v299_v26, %v297_v25  ;;  %v301_v31 = vld [vmem:[#allocation5 + $0xa8] sm:$0xff]  ;;  %v303_v32 = vld [vmem:[#allocation5 + $0xb8] sm:$0xff]  ;;  %v1033_v33 = vpack.c.bf16 %v298_v30, %v296_v29  ;;  %v300_v35 = vld [vmem:[#allocation5 + $0xa0] sm:$0xff]  ;;  %v315_v19 = vshrl.u32 %v314_v18, 7 }
  0x70   : > { %1022 = vmatpush1.bf16.msra.mxu0 %v1021_v15  ;;  %v1035_v34 = vpack.c.bf16 %v303_v32, %v301_v31  ;;  %v302_v36 = vld [vmem:[#allocation5 + $0xb0] sm:$0xff]  ;;  %v305_v37 = vld [vmem:[#allocation5 + $0xc8] sm:$0xff]  ;;  %v307_v38 = vld [vmem:[#allocation5 + $0xd8] sm:$0xff] }
  0x71   : > { %1024 = vmatprep.subr.bf16.mxu0 %v1023_v16  ;;  %v1037_v39 = vpack.c.bf16 %v302_v36, %v300_v35  ;;  %v1039_v40 = vpack.c.bf16 %v307_v38, %v305_v37  ;;  %v304_v41 = vld [vmem:[#allocation5 + $0xc0] sm:$0xff]  ;;  %v306_v42 = vld [vmem:[#allocation5 + $0xd0] sm:$0xff]  ;;  %v309_v43 = vld [vmem:[#allocation5 + $0xe8] sm:$0xff]  ;;  %v320_v20 = vsub.s32 1, %v315_v19 }
  0x72   : > { %v311_v44 = vld [vmem:[#allocation5 + $0xf8] sm:$0xff]  ;;  %v1041_v45 = vpack.c.bf16 %v306_v42, %v304_v41  ;;  %v308_v47 = vld [vmem:[#allocation5 + $0xe0] sm:$0xff]  ;;  %v310_v48 = vld [vmem:[#allocation5 + $0xf0] sm:$0xff] }
  0x73   : > { %v1043_v46 = vpack.c.bf16 %v311_v44, %v309_v43  ;;  %v1045_v49 = vpack.c.bf16 %v310_v48, %v308_v47  ;;  %v272_v50 = vld [vmem:[%s1571_s19] sm:$0xff]  ;;  %v273_v51 = vld [vmem:[%s1571_s19 + $0x8] sm:$0xff]  ;;  %v274_v52 = vld [vmem:[%s1571_s19 + $0x10] sm:$0xff] }
  0x74   : > { %1026 = vmatpush1.bf16.msra.mxu0 %v1025_v21  ;;  %v275_v53 = vld [vmem:[%s1571_s19 + $0x18] sm:$0xff]  ;;  %v276_v54 = vld [vmem:[%s1571_s19 + $0x20] sm:$0xff]  ;;  %v277_v55 = vld [vmem:[%s1571_s19 + $0x28] sm:$0xff] }
  0x75   : > { %1028 = vmatprep.subr.bf16.mxu0 %v1027_v22  ;;  %v278_v56 = vld [vmem:[%s1571_s19 + $0x30] sm:$0xff]  ;;  %v279_v57 = vld [vmem:[%s1571_s19 + $0x38] sm:$0xff]  ;;  %v502_v59 = vld [vmem:[%s1744_s3 + $0x8] sm:$0xff] }
  0x76   : > { %v501_v58 = vld [vmem:[%s1744_s3] sm:$0xff]  ;;  %v503_v61 = vld [vmem:[%s1744_s3 + $0x10] sm:$0xff]  ;;  %v504_v62 = vld [vmem:[%s1744_s3 + $0x18] sm:$0xff] }
  0x77   : > { %v1047_v60 = vpack.c.bf16 %v502_v59, %v501_v58  ;;  %v1051_v63 = vpack.c.bf16 %v504_v62, %v503_v61  ;;  %v505_v0 = vld [vmem:[%s1744_s3 + $0x20] sm:$0xff]  ;;  %v507_v3 = vld [vmem:[%s1744_s3 + $0x30] sm:$0xff]  ;;  %v508_v4 = vld [vmem:[%s1744_s3 + $0x38] sm:$0xff] }
  0x78   : > { %1030 = vmatpush1.bf16.msra.mxu0 %v1029_v27  ;;  %v1059_v5 = vpack.c.bf16 %v508_v4, %v507_v3  ;;  %v509_v6 = vld [vmem:[%s1744_s3 + $0x40] sm:$0xff]  ;;  %v510_v7 = vld [vmem:[%s1744_s3 + $0x48] sm:$0xff]  ;;  %v511_v9 = vld [vmem:[%s1744_s3 + $0x50] sm:$0xff] }
  0x79   : > { %1032 = vmatprep.subr.bf16.mxu0 %v1031_v28  ;;  %1048 = vmatprep.subr.bf16.mxu1 %v1047_v60  ;;  %v1063_v8 = vpack.c.bf16 %v510_v7, %v509_v6  ;;  %v512_v10 = vld [vmem:[%s1744_s3 + $0x58] sm:$0xff]  ;;  %v513_v12 = vld [vmem:[%s1744_s3 + $0x60] sm:$0xff]  ;;  %v514_v13 = vld [vmem:[%s1744_s3 + $0x68] sm:$0xff]  ;;  %v316_v28 = vsub.s32 0, %v315_v19 }
  0x7a   : > { %1050 = vmatpush3.bf16.msra.mxu1 %v1047_v60  ;;  %v1067_v11 = vpack.c.bf16 %v512_v10, %v511_v9  ;;  %v1071_v14 = vpack.c.bf16 %v514_v13, %v513_v12  ;;  %v515_v15 = vld [vmem:[%s1744_s3 + $0x70] sm:$0xff]  ;;  %v516_v16 = vld [vmem:[%s1744_s3 + $0x78] sm:$0xff]  ;;  %v312_v21 = vld [vmem:[%s1743_s2] sm:$0x3] }
  0x7b   : > { %1052 = vmatprep.subr.bf16.mxu1 %v1051_v63  ;;  %v1075_v17 = vpack.c.bf16 %v516_v16, %v515_v15  ;;  %v321_v22 = vrot.slane %v312_v21, %v320_v20 }
  0x7c   : > { %1034 = vmatpush1.bf16.msra.mxu0 %v1033_v33  ;;  %v1648_v33 = vrot.slane %v312_v21, %v316_v28 }
  0x7d   : > { %1036 = vmatprep.subr.bf16.mxu0 %v1035_v34 }
  0x7e   : > { %1054 = vmatpush3.bf16.msra.mxu1 %v1051_v63 }
  0x80   : > { %1038 = vmatpush1.bf16.msra.mxu0 %v1037_v39 }
  0x81   : > { %1040 = vmatprep.subr.bf16.mxu0 %v1039_v40 }
  0x84   : > { %1042 = vmatpush1.bf16.msra.mxu0 %v1041_v45 }
  0x85   : > { %1044 = vmatprep.subr.bf16.mxu0 %v1043_v46 }
  0x88   : > { %1046 = vmatpush1.bf16.msra.mxu0 %v1045_v49 }
  0x8b   : > { %389 = vmatmul.mubr.f32.vlgmr.msra.gmra.mrb[0].mxu0 %v272_v50 }
  0x8c   : > { %394 = vmatprep.mubr.f32.mxu0 %v1406_v1 }
  0x8f   : > { %395 = vmatmul.mubr.f32.gmra.mrb[2].mxu0 %v273_v51 }
  0x90   : > { %400 = vmatprep.mubr.f32.mxu0 %v1406_v1 }
  0x93   : > { %401 = vmatmul.mubr.f32.gmra.mrb[4].mxu0 %v274_v52 }
  0x94   : > { %406 = vmatprep.mubr.f32.mxu0 %v1406_v1 }
  0x97   : > { %407 = vmatmul.mubr.f32.gmra.mrb[6].mxu0 %v275_v53 }
  0x98   : > { %412 = vmatprep.mubr.f32.mxu0 %v1406_v1 }
  0x9b   : > { %413 = vmatmul.mubr.f32.gmra.mrb[8].mxu0 %v276_v54 }
  0x9c   : > { %418 = vmatprep.mubr.f32.mxu0 %v1406_v1 }
  0x9f   : > { %419 = vmatmul.mubr.f32.gmra.mrb[10].mxu0 %v277_v55 }
  0xa0   : > { %424 = vmatprep.mubr.f32.mxu0 %v1406_v1 }
  0xa3   : > { %425 = vmatmul.mubr.f32.gmra.mrb[12].mxu0 %v278_v56 }
  0xa4   : > { %430 = vmatprep.mubr.f32.mxu0 %v1406_v1  ;;  %v506_v1 = vld [vmem:[%s1744_s3 + $0x28] sm:$0xff] }
  0xa5   : > { %v1055_v2 = vpack.c.bf16 %v506_v1, %v505_v0 }
  0xa7   : > { %431 = vmatmul.mubr.f32.gmra.mrb[14].mxu0 %v279_v57  ;;  %1056 = vmatprep.subr.bf16.mxu1 %v1055_v2 }
  0xa8   : > { %1058 = vmatpush3.bf16.msra.mxu1 %v1055_v2 }
  0xa9   : > { %1060 = vmatprep.subr.bf16.mxu1 %v1059_v5 }
  0xac   : > { %1062 = vmatpush3.bf16.msra.mxu1 %v1059_v5 }
  0xad   : > { %1064 = vmatprep.subr.bf16.mxu1 %v1063_v8 }
  0xb0   : > { %1066 = vmatpush3.bf16.msra.mxu1 %v1063_v8 }
  0xb1   : > { %1068 = vmatprep.subr.bf16.mxu1 %v1067_v11 }
  0xb4   : > { %1070 = vmatpush3.bf16.msra.mxu1 %v1067_v11 }
  0xb5   : > { %1072 = vmatprep.subr.bf16.mxu1 %v1071_v14 }
  0xb8   : > { %1074 = vmatpush3.bf16.msra.mxu1 %v1071_v14 }
  0xb9   : > { %1076 = vmatprep.subr.bf16.mxu1 %v1075_v17 }
  0xbc   : > { %1078 = vmatpush3.bf16.msra.mxu1 %v1075_v17 }
 0x15e   : > { %v390_v23 = vpop.f32.mrb[0].mxu0 }
 0x15f   : > { %v392_v24 = vpop.f32.mrb[1].mxu0  ;;  %v391_v38 = vadd.f32 %v390_v23, %v1648_v33 }
 0x160   : > { %v393_v25 = vadd.f32 %v392_v24, %v321_v22 }
 0x162   : > { %v917_v26 = vmul.f32 -1.442695, %v393_v25  ;;  %v396_v27 = vpop.f32.mrb[2].mxu0 }
 0x163   : > { %v398_v29 = vpop.f32.mrb[3].mxu0  ;;  %v397_v45 = vadd.f32 %v396_v27, %v1648_v33 }
 0x164   : > { %1192 = vpow2.f32 %v917_v26  ;;  %v399_v30 = vadd.f32 %v398_v29, %v321_v22 }
 0x166   : > { %v918_v31 = vmul.f32 -1.442695, %v399_v30  ;;  %v402_v32 = vpop.f32.mrb[4].mxu0 }
 0x167   : > { %v404_v34 = vpop.f32.mrb[5].mxu0  ;;  %v403_v52 = vadd.f32 %v402_v32, %v1648_v33 }
 0x168   : > { %1194 = vpow2.f32 %v918_v31  ;;  %v405_v35 = vadd.f32 %v404_v34, %v321_v22 }
 0x16a   : > { %v919_v36 = vmul.f32 -1.442695, %v405_v35  ;;  %v408_v37 = vpop.f32.mrb[6].mxu0 }
 0x16b   : > { %v410_v39 = vpop.f32.mrb[7].mxu0  ;;  %v409_v59 = vadd.f32 %v408_v37, %v1648_v33 }
 0x16c   : > { %1196 = vpow2.f32 %v919_v36  ;;  %v411_v40 = vadd.f32 %v410_v39, %v321_v22 }
 0x16d   : > { %1198 = vtanh.f32 %v391_v38 }
 0x16e   : > { %v1193_v41 = vpop.eup %1192  ;;  %v920_v42 = vmul.f32 -1.442695, %v411_v40  ;;  %v414_v43 = vpop.f32.mrb[8].mxu0 }
 0x16f   : > { %v469_v44 = vadd.f32 1.0, %v1193_v41  ;;  %v416_v46 = vpop.f32.mrb[9].mxu0  ;;  %v415_v4 = vadd.f32 %v414_v43, %v1648_v33  ;;  %v925_v41 = vld [vmem:[#allocation2] ss:$0 sm:$0xff] }
 0x170   : > { %1200 = vpow2.f32 %v920_v42  ;;  %v417_v47 = vadd.f32 %v416_v46, %v321_v22 }
 0x171   : > { %1202 = vrcp.f32 %v469_v44 }
 0x172   : > { %v1195_v48 = vpop.eup %1194  ;;  %v921_v49 = vmul.f32 -1.442695, %v417_v47  ;;  %v420_v50 = vpop.f32.mrb[10].mxu0  ;;  %1204 = vtanh.f32 %v397_v45 }
 0x173   : > { %v470_v51 = vadd.f32 1.0, %v1195_v48  ;;  %v422_v53 = vpop.f32.mrb[11].mxu0  ;;  %v421_v13 = vadd.f32 %v420_v50, %v1648_v33 }
 0x174   : > { %1206 = vpow2.f32 %v921_v49  ;;  %v423_v54 = vadd.f32 %v422_v53, %v321_v22 }
 0x175   : > { %1208 = vrcp.f32 %v470_v51 }
 0x176   : > { %v1197_v55 = vpop.eup %1196  ;;  %v922_v56 = vmul.f32 -1.442695, %v423_v54  ;;  %v426_v57 = vpop.f32.mrb[12].mxu0  ;;  %1210 = vtanh.f32 %v403_v52 }
 0x177   : > { %v471_v58 = vadd.f32 1.0, %v1197_v55  ;;  %v428_v60 = vpop.f32.mrb[13].mxu0  ;;  %v1199_v62 = vpop.eup %1198  ;;  %v427_v19 = vadd.f32 %v426_v57, %v1648_v33 }
 0x178   : > { %1212 = vpow2.f32 %v922_v56  ;;  %v429_v61 = vadd.f32 %v428_v60, %v321_v22 }
 0x179   : > { %1214 = vrcp.f32 %v471_v58 }
 0x17a   : > { %v1201_v63 = vpop.eup %1200  ;;  %v923_v0 = vmul.f32 -1.442695, %v429_v61  ;;  %v432_v1 = vpop.f32.mrb[14].mxu0  ;;  %1216 = vtanh.f32 %v409_v59 }
 0x17b   : > { %v1203_v2 = vpop.eup %1202  ;;  %v472_v3 = vadd.f32 1.0, %v1201_v63  ;;  %v434_v5 = vpop.f32.mrb[15].mxu0  ;;  %v433_v25 = vadd.f32 %v432_v1, %v1648_v33 }
 0x17c   : > { %1218 = vpow2.f32 %v923_v0  ;;  %v435_v6 = vadd.f32 %v434_v5, %v321_v22  ;;  %v493_v7 = vmul.f32 %v1203_v2, %v1199_v62  ;;  %v1205_v8 = vpop.eup %1204 }
 0x17d   : > { %1220 = vrcp.f32 %v472_v3 }
 0x17e   : > { %v1207_v9 = vpop.eup %1206  ;;  %v924_v10 = vmul.f32 -1.442695, %v435_v6  ;;  %1003 = vmatprep.mubr.f32.mxu1 %v493_v7  ;;  %1222 = vtanh.f32 %v415_v4 }
 0x17f   : > { %v1209_v11 = vpop.eup %1208  ;;  %v473_v12 = vadd.f32 1.0, %v1207_v9 }
 0x180   : > { %1224 = vpow2.f32 %v924_v10  ;;  %v494_v14 = vmul.f32 %v1209_v11, %v1205_v8  ;;  %v1211_v15 = vpop.eup %1210 }
 0x181   : > { %1226 = vrcp.f32 %v473_v12 }
 0x182   : > { %v1213_v16 = vpop.eup %1212  ;;  %1004 = vmatmul.mubr.f32.vlgmr.msra.gmra.mrb[0].mxu1 %v494_v14  ;;  %1228 = vtanh.f32 %v421_v13 }
 0x183   : > { %v1215_v17 = vpop.eup %1214  ;;  %v474_v18 = vadd.f32 1.0, %v1213_v16 }
 0x184   : > { %v495_v20 = vmul.f32 %v1215_v17, %v1211_v15  ;;  %v1217_v21 = vpop.eup %1216 }
 0x185   : > { %1230 = vrcp.f32 %v474_v18 }
 0x186   : > { %v1219_v22 = vpop.eup %1218  ;;  %1006 = vmatprep.mubr.f32.mxu1 %v495_v20  ;;  %1232 = vtanh.f32 %v427_v19 }
 0x187   : > { %v1221_v23 = vpop.eup %1220  ;;  %v475_v24 = vadd.f32 1.0, %v1219_v22 }
 0x188   : > { %v496_v26 = vmul.f32 %v1221_v23, %v1217_v21  ;;  %v1223_v27 = vpop.eup %1222 }
 0x189   : > { %1234 = vrcp.f32 %v475_v24 }
 0x18a   : > { %v1225_v28 = vpop.eup %1224  ;;  %1007 = vmatmul.mubr.f32.gmra.mrb[2].mxu1 %v496_v26  ;;  %1236 = vtanh.f32 %v433_v25 }
 0x18b   : > { %v1227_v29 = vpop.eup %1226  ;;  %v476_v30 = vadd.f32 1.0, %v1225_v28 }
 0x18c   : > { %v497_v31 = vmul.f32 %v1227_v29, %v1223_v27  ;;  %v1229_v32 = vpop.eup %1228 }
 0x18d   : > { %1238 = vrcp.f32 %v476_v30 }
 0x18e   : > { %1009 = vmatprep.mubr.f32.mxu1 %v497_v31 }
 0x18f   : > { %v1231_v34 = vpop.eup %1230 }
 0x190   : > { %v498_v35 = vmul.f32 %v1231_v34, %v1229_v32  ;;  %v1233_v36 = vpop.eup %1232 }
 0x192   : > { %1010 = vmatmul.mubr.f32.gmra.mrb[4].mxu1 %v498_v35 }
 0x193   : > { %v1235_v37 = vpop.eup %1234 }
 0x194   : > { %v499_v38 = vmul.f32 %v1235_v37, %v1233_v36  ;;  %v1237_v33 = vpop.eup %1236 }
 0x196   : > { %1012 = vmatprep.mubr.f32.mxu1 %v499_v38 }
 0x197   : > { %v1239_v39 = vpop.eup %1238 }
 0x198   : > { %v500_v40 = vmul.f32 %v1239_v39, %v1237_v33 }
 0x19a   : > { %1013 = vmatmul.mubr.f32.gmra.mrb[6].mxu1 %v500_v40 }
 0x255   : > { %v1005_v42 = vpop.f32.mrb[0].mxu1 }
 0x256   : > { %v596_v43 = vadd.f32 %v1005_v42, %v925_v41  ;;  %v590_v44 = vpop.f32.mrb[1].mxu1 }
 0x257   : > { %v591_v45 = vadd.f32 %v925_v41, %v590_v44 }
 0x258   : > { %631 = vst.msk [vmem:[%s1659_s28 + $0x8] sm:$0xff] %vm629_vm0, %v596_v43 }
 0x259   : > { %630 = vst.msk [vmem:[%s1659_s28] sm:$0xff] %vm629_vm0, %v591_v45 }
 0x25d   : > { %v1008_v46 = vpop.f32.mrb[2].mxu1 }
 0x25e   : > { %v606_v47 = vadd.f32 %v1008_v46, %v925_v41  ;;  %v600_v48 = vpop.f32.mrb[3].mxu1 }
 0x25f   : > { %v601_v49 = vadd.f32 %v925_v41, %v600_v48 }
 0x260   : > { %633 = vst.msk [vmem:[%s1659_s28 + $0x18] sm:$0xff] %vm629_vm0, %v606_v47 }
 0x261   : > { %632 = vst.msk [vmem:[%s1659_s28 + $0x10] sm:$0xff] %vm629_vm0, %v601_v49 }
 0x265   : > { %v1011_v50 = vpop.f32.mrb[4].mxu1 }
 0x266   : > { %v616_v51 = vadd.f32 %v1011_v50, %v925_v41  ;;  %v610_v52 = vpop.f32.mrb[5].mxu1 }
 0x267   : > { %v611_v53 = vadd.f32 %v925_v41, %v610_v52 }
 0x268   : > { %635 = vst.msk [vmem:[%s1659_s28 + $0x28] sm:$0xff] %vm629_vm0, %v616_v51 }
 0x269   : > { %634 = vst.msk [vmem:[%s1659_s28 + $0x20] sm:$0xff] %vm629_vm0, %v611_v53 }
 0x26b   : > { %644 = sbr.rel (!%p1760_p6) target bundleno = 675 (0x2a3), region = 52 }
 0x26d   : > { %v1014_v54 = vpop.f32.mrb[6].mxu1 }
 0x26e   : > { %v626_v55 = vadd.f32 %v1014_v54, %v925_v41  ;;  %v620_v56 = vpop.f32.mrb[7].mxu1 }
 0x26f   : > { %v621_v57 = vadd.f32 %v925_v41, %v620_v56 }
 0x270   : > { %637 = vst.msk [vmem:[%s1659_s28 + $0x38] sm:$0xff] %vm629_vm0, %v626_v55 }
 0x271   : > { %636 = vst.msk [vmem:[%s1659_s28 + $0x30] sm:$0xff] %vm629_vm0, %v621_v57 }
 0x272   : > { %s1771_s18 = smov (!%p647_p7, %s646_s18), 8 }
 0x273   : > { %s928_s12 = sshll.u32 %s1771_s18, 7 }
 0x274   : > { %p931_p9 = scmp.eq.s32.totalorder %s928_s12, 0 }
 0x275   : > { %s1690_s30 = sshrl.u32 (!%p931_p9), %s1771_s18, 3 }
 0x276   : > { %655 = sbr.rel (%p931_p9) target bundleno = 675 (0x2a3), region = 56  ;;  %p932_p12 = scmp.le.s32.totalorder (!%p931_p9), %s1690_s30, 0 }
 0x27d   : > { %846 = sbr.rel (%p932_p12) target bundleno = 654 (0x28e), region = 138  ;;  %s1761_s4 = smov (!%p932_p12), %s1684_s6 }
 0x27e   : > { %s1762_s13 = smov (!%p932_p12), %s1659_s28  ;;  %s1699_s16 = smov (!%p932_p12), 0  }
 0x27f   : > { %s1701_s17 = smov (!%p932_p12), 0  }
 0x284 LB: >> { %v731_v58 = vld [vmem:[%s1374_s13] sm:$0xff]  ;;  %v733_v59 = vld [vmem:[%s1374_s13 + $0x8] sm:$0xff]  ;;  %v735_v60 = vld [vmem:[%s1374_s13 + $0x10] sm:$0xff]  ;;  %s747_s20 = sadd.s32 1, %s1378_s16  ;;  %s725_s17 = sadd.s32 1, %s1382_s17   ;;  %s1382_s17 = sphi %s1701_s17, %s725_s17   ;;  %s1378_s16 = sphi %s1699_s16, %s1763_s16   ;;  %s1374_s13 = sphi %s1762_s13, %s752_s13   ;;  %s1370_s4 = sphi %s1761_s4, %s753_s4  }
 0x285   : >> { %732 = vst [vmem:[%s1370_s4] sm:$0xff] %v731_v58  ;;  %734 = vst [vmem:[%s1370_s4 + $0x8] sm:$0xff] %v733_v59  ;;  %v737_v61 = vld [vmem:[%s1374_s13 + $0x18] sm:$0xff]  ;;  %v739_v62 = vld [vmem:[%s1374_s13 + $0x20] sm:$0xff]  ;;  %p748_p0 = scmp.ge.s32.totalorder %s747_s20, %s1690_s30  ;;  %p724_p2 = scmp.ge.s32.totalorder %s725_s17, %s1690_s30 }
 0x286   : >> { %736 = vst [vmem:[%s1370_s4 + $0x10] sm:$0xff] %v735_v60  ;;  %v741_v63 = vld [vmem:[%s1374_s13 + $0x28] sm:$0xff]  ;;  %738 = vst [vmem:[%s1370_s4 + $0x18] sm:$0xff] %v737_v61  ;;  %v743_v0 = vld [vmem:[%s1374_s13 + $0x30] sm:$0xff] }
 0x287   : >> { %740 = vst [vmem:[%s1370_s4 + $0x20] sm:$0xff] %v739_v62  ;;  %742 = vst [vmem:[%s1370_s4 + $0x28] sm:$0xff] %v741_v63  ;;  %v745_v1 = vld [vmem:[%s1374_s13 + $0x38] sm:$0xff]  ;;  %s1773_s20 = smov (%p748_p0, %s747_s20), 0  ;;  %727 = sbr.rel (!%p724_p2) target bundleno = 644 (0x284), region = 144 }
 0x288   : >> { %744 = vst [vmem:[%s1370_s4 + $0x30] sm:$0xff] %v743_v0  ;;  %746 = vst [vmem:[%s1370_s4 + $0x38] sm:$0xff] %v745_v1  ;;  %s933_s23 = sshll.u32 %s1773_s20, 6  ;;  %s1763_s16 = smov %s1773_s20 }
 0x289   : >> { %s752_s13 = scalar_lea.vmem %s1659_s28, %s933_s23 [#allocation7]   ;;  %s753_s4 = scalar_lea.vmem %s1684_s6, %s933_s23  }
 0x28e PF: > { %s1720_s25 = sand.u32 7, %s1771_s18   ;;  %s945_s26 = sshll.u32 %s1690_s30, 6 }
 0x28f   : > { %s758_s7 = scalar_lea.vmem %s1659_s28, %s945_s26 [#allocation7]   ;;  %s760_s10 = scalar_lea.vmem %s1684_s6, %s945_s26  }
 0x290   : > { %p938_p4 = scmp.le.s32.totalorder %s1720_s25, 0 }
 0x291   : > { %s1384_s11 = smov (!%p938_p4), %s760_s10   ;;  %s1388_s9 = smov (!%p938_p4), %s758_s7  }
 0x292   : > { %860 = sbr.rel (%p938_p4) target bundleno = 675 (0x2a3), region = 149  ;;  %s1392_s8 = smov (!%p938_p4), 0  }
 0x293   : > { %s1396_s15 = smov (!%p938_p4), 0  }
 0x299 LB: >> { %v770_v2 = vld [vmem:[%s1390_s9] sm:$0xff]  ;;  %s772_s14 = sadd.s32 1, %s1394_s8  ;;  %s764_s15 = sadd.s32 1, %s1398_s15   ;;  %s1398_s15 = sphi %s1396_s15, %s764_s15   ;;  %s1394_s8 = sphi %s1392_s8, %s1393_s8   ;;  %s1390_s9 = sphi %s1388_s9, %s777_s9   ;;  %s1386_s11 = sphi %s1384_s11, %s778_s11  }
 0x29a   : >> { %771 = vst [vmem:[%s1386_s11] sm:$0xff] %v770_v2  ;;  %p773_p8 = scmp.ge.s32.totalorder %s772_s14, %s1720_s25  ;;  %p763_p10 = scmp.ge.s32.totalorder %s764_s15, %s1720_s25 }
 0x29c   : >> { %s1775_s14 = smov (%p773_p8, %s772_s14), 0  ;;  %766 = sbr.rel (!%p763_p10) target bundleno = 665 (0x299), region = 155 }
 0x29d   : >> { %s939_s28 = sshll.u32 %s1775_s14, 3  ;;  %s1393_s8 = smov %s1775_s14  }
 0x29e   : >> { %s777_s9 = scalar_lea.vmem %s758_s7, %s939_s28 [#allocation7]   ;;  %s778_s11 = scalar_lea.vmem %s760_s10, %s939_s28  }
 0x2a3 PF: > { %p18_p13 = scmp.ge.s32.totalorder %s1462_s24, 6   ;;  %s1764_s20 = smov %s1358_s21 }
 0x2a4   : > { %s1765_s21 = smov %s1362_s22  ;;  %s1766_s22 = smov %s1472_s27 }
 0x2a5   : > { %s1767_s23 = smov %s1462_s24  ;;  %20 = sbr.rel (!%p18_p13) target bundleno = 7 (0x7), region = 166 }
 0x2ac   :  { %794 = vsyncpa [#allocation4], 1 }
 0x2ad   :  { %796 = vsyncpa [#allocation4 + $0x1], 1 }
 0x2ae   :  { %797 = vsyncpa [#allocation6], 1 }

</bundles_post_ra>
